<compile_context>
chip_gen: v7x
topology: tpu7x:2x2x1
jax: 0.10.0
libtpu: 0.0.40
codegen_flags: <defaults>
</compile_context>

<pallas_src>
import functools

import jax
import jax.numpy as jnp
from jax.experimental import pallas as pl
from jax.experimental.pallas import tpu as pltpu


def _conv2d_block_kernel(x_ref, w1_ref, b1_ref, w2_ref, b2_ref, o_ref,
                         xpad_ref, mid_ref, *, H, W, KH, KW, Cin, Cout, activ_type):
    """Fused conv3x3 -> conv3x3 -> activation for one image (channel-dense 2D layout).

    x_ref:    (1, H, W*Cin)          unpadded image, bf16
    w1_ref:   (KH*Wp*Cin, W*Cout)    banded block-Toeplitz conv1 weights, bf16
    b1_ref:   (1, W*Cout)            conv1 bias tiled over x, f32
    w2_ref:   (KH*Wp*Cout, W*Cout)   banded conv2 weights, bf16
    b2_ref:   (1, W*Cout)            conv2 bias tiled over x, f32
    o_ref:    (1, H, W*Cout)         lane-dense output, f32
    xpad_ref: (Hp, Wp*Cin)  f32 VMEM scratch (zero-padded input)
    mid_ref:  (Hp, Wp*Cout) f32 VMEM scratch (zero-padded conv1 output)
    """
    ph, pw = (KH - 1) // 2, (KW - 1) // 2  # assumes odd kernel (PyTorch 'same', zeros)

    def zero_halo(ref, top_rows, side_cols):
        rows, cols = ref.shape
        if top_rows:
            ref[0:top_rows, :] = jnp.zeros((top_rows, cols), ref.dtype)
            ref[rows - top_rows:rows, :] = jnp.zeros((top_rows, cols), ref.dtype)
        if side_cols:
            ref[:, 0:side_cols] = jnp.zeros((rows, side_cols), ref.dtype)
            ref[:, cols - side_cols:cols] = jnp.zeros((rows, side_cols), ref.dtype)

    # Zero only the padding halo (interior is fully overwritten below). Done every step so it
    # stays correct if the 'parallel' batch axis is sharded across TensorCores.
    zero_halo(xpad_ref, ph, pw * Cin)
    zero_halo(mid_ref, ph, pw * Cout)

    # In-kernel 'same' zero padding: copy the unpadded image into the scratch interior.
    xpad_ref[ph:ph + H, pw * Cin:pw * Cin + W * Cin] = x_ref[0].astype(xpad_ref.dtype)

    # ---- conv1: all KH*KW taps folded into a single bf16 MXU contraction ----
    slab1 = jnp.concatenate([xpad_ref[ky:ky + H, :] for ky in range(KH)], axis=1)
    y1 = jnp.dot(slab1.astype(jnp.bfloat16), w1_ref[...],
                 preferred_element_type=jnp.float32) + b1_ref[...]        # (H, W*Cout) f32

    # Re-pad conv1 output for the second 'same' conv (halo already zeroed above).
    mid_ref[ph:ph + H, pw * Cout:pw * Cout + W * Cout] = y1

    # ---- conv2 ----
    slab2 = jnp.concatenate([mid_ref[ky:ky + H, :] for ky in range(KH)], axis=1)
    y2 = jnp.dot(slab2.astype(jnp.bfloat16), w2_ref[...],
                 preferred_element_type=jnp.float32) + b2_ref[...]        # (H, W*Cout) f32

    # ---- activation ----
    # TODO(synk): the `Activation` class body was not provided; supporting None / "relu" / "tanh".
    if activ_type == "relu":
        y2 = jnp.maximum(y2, 0.0)
    elif activ_type == "tanh":
        y2 = jnp.tanh(y2)

    o_ref[0] = y2.astype(o_ref.dtype)


def _banded_weight(w, W_out, Wp):
    """HWIO conv weight (KH, KW, Ci, Co) -> banded matrix (KH*Wp*Ci, W_out*Co).

    big[ky*Wp*Ci + xp*Ci + ci, x*Co + co] = w[ky, kx, ci, co] iff xp == x + kx, else 0.
    """
    KH, KW, Ci, Co = w.shape
    xp = jnp.arange(Wp)[None, :, None]
    x = jnp.arange(W_out)[None, None, :]
    kx = jnp.arange(KW)[:, None, None]
    sel = (xp == x + kx).astype(w.dtype)                 # (KW, Wp, W_out)
    big = jnp.einsum('kpx,hkio->hpixo', sel, w)          # (KH, Wp, Ci, W_out, Co)
    return big.reshape(KH * Wp * Ci, W_out * Co)


def conv2d_block(x_nchw, w1, b1, w2, b2, *, activ_type=None):
    """Conv2DBlock forward. x_nchw: (B, Cin, H, W). Returns (B, Cout, H, W) float32."""
    B, Cin, H, W = x_nchw.shape
    KH, KW, _, Cout = w1.shape
    Hp, Wp = H + KH - 1, W + KW - 1

    # NCHW -> channel-dense rows (B, H, W*Cin), bf16 (halves the input DMA).
    # (A channels-last caller could skip this transpose entirely.)
    x2d = jnp.transpose(x_nchw, (0, 2, 3, 1)).reshape(B, H, W * Cin).astype(jnp.bfloat16)

    w1_big = _banded_weight(w1.astype(jnp.float32), W, Wp).astype(jnp.bfloat16)   # (KH*Wp*Cin,  W*Cout)
    w2_big = _banded_weight(w2.astype(jnp.float32), W, Wp).astype(jnp.bfloat16)   # (KH*Wp*Cout, W*Cout)
    b1_big = jnp.tile(b1.astype(jnp.float32), W)[None, :]                          # (1, W*Cout)
    b2_big = jnp.tile(b2.astype(jnp.float32), W)[None, :]

    kernel = functools.partial(_conv2d_block_kernel, H=H, W=W, KH=KH, KW=KW,
                               Cin=Cin, Cout=Cout, activ_type=activ_type)

    out2d = pl.pallas_call(
        kernel,
        out_shape=jax.ShapeDtypeStruct((B, H, W * Cout), jnp.float32),
        grid_spec=pltpu.PrefetchScalarGridSpec(
            num_scalar_prefetch=0,
            grid=(B,),
            in_specs=[
                pl.BlockSpec((1, H, W * Cin), lambda b: (b, 0, 0)),
                pl.BlockSpec((KH * Wp * Cin, W * Cout), lambda b: (0, 0)),
                pl.BlockSpec((1, W * Cout), lambda b: (0, 0)),
                pl.BlockSpec((KH * Wp * Cout, W * Cout), lambda b: (0, 0)),
                pl.BlockSpec((1, W * Cout), lambda b: (0, 0)),
            ],
            out_specs=pl.BlockSpec((1, H, W * Cout), lambda b: (b, 0, 0)),
            scratch_shapes=[
                pltpu.VMEM((Hp, Wp * Cin), jnp.float32),    # zero-padded input
                pltpu.VMEM((Hp, Wp * Cout), jnp.float32),   # zero-padded conv1 output
            ],
        ),
        compiler_params=pltpu.CompilerParams(
            dimension_semantics=("parallel",),
            vmem_limit_bytes=32 * 1024 * 1024,
        ),
    )(x2d, w1_big, b1_big, w2_big, b2_big)

    out_nhwc = out2d.reshape(B, H, W, Cout)
    return jnp.transpose(out_nhwc, (0, 3, 1, 2)).astype(jnp.float32)


def _reference(x_nchw, w1, b1, w2, b2, activ_type):
    """Pure-JAX f32 reference matching nn.Conv2d(padding='same', padding_mode='zeros')."""
    x = jnp.transpose(x_nchw, (0, 2, 3, 1))
    dn = ("NHWC", "HWIO", "NHWC")
    y = jax.lax.conv_general_dilated(x, w1, (1, 1), "SAME", dimension_numbers=dn) + b1
    y = jax.lax.conv_general_dilated(y, w2, (1, 1), "SAME", dimension_numbers=dn) + b2
    if activ_type == "relu":
        y = jnp.maximum(y, 0.0)
    elif activ_type == "tanh":
        y = jnp.tanh(y)
    return jnp.transpose(y, (0, 3, 1, 2))


if __name__ == "__main__":
    B, Cin, Cout, H, W, K = 2, 4, 8, 16, 16, 3
    key = jax.random.PRNGKey(0)
    k_x, k_w1, k_b1, k_w2, k_b2 = jax.random.split(key, 5)

    x = jax.random.normal(k_x, (B, Cin, H, W), jnp.float32)

    # PyTorch-style uniform(-1/sqrt(fan_in), 1/sqrt(fan_in)) init, HWIO weight layout.
    bnd1 = (Cin * K * K) ** -0.5
    bnd2 = (Cout * K * K) ** -0.5
    w1 = jax.random.uniform(k_w1, (K, K, Cin, Cout), jnp.float32, -bnd1, bnd1)
    b1 = jax.random.uniform(k_b1, (Cout,), jnp.float32, -bnd1, bnd1)
    w2 = jax.random.uniform(k_w2, (K, K, Cout, Cout), jnp.float32, -bnd2, bnd2)
    b2 = jax.random.uniform(k_b2, (Cout,), jnp.float32, -bnd2, bnd2)

    activ_type = "relu"
    out = conv2d_block(x, w1, b1, w2, b2, activ_type=activ_type)
    out = jax.block_until_ready(out)

    ref = _reference(x, w1, b1, w2, b2, activ_type)
    assert out.shape == (B, Cout, H, W)
    err = float(jnp.max(jnp.abs(out - ref)))
    # bf16 MXU operands (f32 accumulation) -> loosened tolerance vs the pure-f32 reference.
    assert jnp.allclose(out, ref, atol=5e-2, rtol=5e-2), f"max abs err {err}"
    print("KERNEL_OK")
</pallas_src>

<mosaic_0001>
module attributes {stable_mosaic.version = 11 : i64} {
  func.func @_conv2d_block_kernel(%arg0: i32, %arg1: memref<1x16x64xbf16, #tpu.memory_space<vmem>>, %arg2: memref<216x128xbf16, #tpu.memory_space<vmem>>, %arg3: memref<1x128xf32, #tpu.memory_space<vmem>>, %arg4: memref<432x128xbf16, #tpu.memory_space<vmem>>, %arg5: memref<1x128xf32, #tpu.memory_space<vmem>>, %arg6: memref<1x16x128xf32, #tpu.memory_space<vmem>>, %arg7: memref<18x72xf32, #tpu.memory_space<vmem>>, %arg8: memref<18x144xf32, #tpu.memory_space<vmem>>) attributes {dimension_semantics = [#tpu.dimension_semantics<parallel>], iteration_bounds = array<i64: 2>, scalar_prefetch = 0 : i64, scratch_operands = 2 : i64, tpu.core_type = #tpu.core_type<tc>, window_params = [{transform_indices = @transform_0, window_bounds = array<i64: 1, 16, 64>}, {pipeline_mode = #tpu.pipeline_mode<synchronous>, transform_indices = @transform_1, window_bounds = array<i64: 216, 128>}, {pipeline_mode = #tpu.pipeline_mode<synchronous>, transform_indices = @transform_2, window_bounds = array<i64: 1, 128>}, {pipeline_mode = #tpu.pipeline_mode<synchronous>, transform_indices = @transform_3, window_bounds = array<i64: 432, 128>}, {pipeline_mode = #tpu.pipeline_mode<synchronous>, transform_indices = @transform_4, window_bounds = array<i64: 1, 128>}, {transform_indices = @transform_5, window_bounds = array<i64: 1, 16, 128>}]} {
    %cst = arith.constant 0.000000e+00 : f32
    %0 = vector.broadcast %cst : f32 to vector<1x72xf32>
    %c0 = arith.constant 0 : index
    %c0_0 = arith.constant 0 : index
    %1 = vector.load %arg7[%c0, %c0_0] : memref<18x72xf32, #tpu.memory_space<vmem>>, vector<1x72xf32>
    tpu.vector_store %arg7[%c0, %c0_0], %0 {strides = array<i32>} : memref<18x72xf32, #tpu.memory_space<vmem>>, vector<1x72xf32>,
    %cst_1 = arith.constant 0.000000e+00 : f32
    %2 = vector.broadcast %cst_1 : f32 to vector<1x72xf32>
    %c17 = arith.constant 17 : index
    %c0_2 = arith.constant 0 : index
    %3 = vector.load %arg7[%c17, %c0_2] : memref<18x72xf32, #tpu.memory_space<vmem>>, vector<1x72xf32>
    tpu.vector_store %arg7[%c17, %c0_2], %2 {strides = array<i32>} : memref<18x72xf32, #tpu.memory_space<vmem>>, vector<1x72xf32>,
    %cst_3 = arith.constant 0.000000e+00 : f32
    %4 = vector.broadcast %cst_3 : f32 to vector<18x4xf32>
    %c0_4 = arith.constant 0 : index
    %c0_5 = arith.constant 0 : index
    %5 = vector.load %arg7[%c0_4, %c0_5] : memref<18x72xf32, #tpu.memory_space<vmem>>, vector<18x4xf32>
    tpu.vector_store %arg7[%c0_4, %c0_5], %4 {strides = array<i32>} : memref<18x72xf32, #tpu.memory_space<vmem>>, vector<18x4xf32>,
    %cst_6 = arith.constant 0.000000e+00 : f32
    %6 = vector.broadcast %cst_6 : f32 to vector<18x4xf32>
    %c0_7 = arith.constant 0 : index
    %c68 = arith.constant 68 : index
    %7 = vector.load %arg7[%c0_7, %c68] : memref<18x72xf32, #tpu.memory_space<vmem>>, vector<18x4xf32>
    tpu.vector_store %arg7[%c0_7, %c68], %6 {strides = array<i32>} : memref<18x72xf32, #tpu.memory_space<vmem>>, vector<18x4xf32>,
    %cst_8 = arith.constant 0.000000e+00 : f32
    %8 = vector.broadcast %cst_8 : f32 to vector<1x144xf32>
    %c0_9 = arith.constant 0 : index
    %c0_10 = arith.constant 0 : index
    %9 = vector.load %arg8[%c0_9, %c0_10] : memref<18x144xf32, #tpu.memory_space<vmem>>, vector<1x144xf32>
    tpu.vector_store %arg8[%c0_9, %c0_10], %8 {strides = array<i32>} : memref<18x144xf32, #tpu.memory_space<vmem>>, vector<1x144xf32>,
    %cst_11 = arith.constant 0.000000e+00 : f32
    %10 = vector.broadcast %cst_11 : f32 to vector<1x144xf32>
    %c17_12 = arith.constant 17 : index
    %c0_13 = arith.constant 0 : index
    %11 = vector.load %arg8[%c17_12, %c0_13] : memref<18x144xf32, #tpu.memory_space<vmem>>, vector<1x144xf32>
    tpu.vector_store %arg8[%c17_12, %c0_13], %10 {strides = array<i32>} : memref<18x144xf32, #tpu.memory_space<vmem>>, vector<1x144xf32>,
    %cst_14 = arith.constant 0.000000e+00 : f32
    %12 = vector.broadcast %cst_14 : f32 to vector<18x8xf32>
    %c0_15 = arith.constant 0 : index
    %c0_16 = arith.constant 0 : index
    %13 = vector.load %arg8[%c0_15, %c0_16] : memref<18x144xf32, #tpu.memory_space<vmem>>, vector<18x8xf32>
    tpu.vector_store %arg8[%c0_15, %c0_16], %12 {strides = array<i32>} : memref<18x144xf32, #tpu.memory_space<vmem>>, vector<18x8xf32>,
    %cst_17 = arith.constant 0.000000e+00 : f32
    %14 = vector.broadcast %cst_17 : f32 to vector<18x8xf32>
    %c0_18 = arith.constant 0 : index
    %c136 = arith.constant 136 : index
    %15 = vector.load %arg8[%c0_18, %c136] : memref<18x144xf32, #tpu.memory_space<vmem>>, vector<18x8xf32>
    tpu.vector_store %arg8[%c0_18, %c136], %14 {strides = array<i32>} : memref<18x144xf32, #tpu.memory_space<vmem>>, vector<18x8xf32>,
    %c0_19 = arith.constant 0 : index
    %c0_20 = arith.constant 0 : index
    %c0_21 = arith.constant 0 : index
    %16 = vector.load %arg1[%c0_19, %c0_20, %c0_21] : memref<1x16x64xbf16, #tpu.memory_space<vmem>>, vector<1x16x64xbf16>
    %17 = vector.shape_cast %16 : vector<1x16x64xbf16> to vector<16x64xbf16>
    %18 = arith.extf %17 : vector<16x64xbf16> to vector<16x64xf32>
    %c1 = arith.constant 1 : index
    %c4 = arith.constant 4 : index
    %19 = vector.load %arg7[%c1, %c4] : memref<18x72xf32, #tpu.memory_space<vmem>>, vector<16x64xf32>
    tpu.vector_store %arg7[%c1, %c4], %18 {strides = array<i32>} : memref<18x72xf32, #tpu.memory_space<vmem>>, vector<16x64xf32>,
    %c0_22 = arith.constant 0 : index
    %c0_23 = arith.constant 0 : index
    %20 = vector.load %arg7[%c0_22, %c0_23] : memref<18x72xf32, #tpu.memory_space<vmem>>, vector<16x72xf32>
    %c1_24 = arith.constant 1 : index
    %c0_25 = arith.constant 0 : index
    %21 = vector.load %arg7[%c1_24, %c0_25] : memref<18x72xf32, #tpu.memory_space<vmem>>, vector<16x72xf32>
    %c2 = arith.constant 2 : index
    %c0_26 = arith.constant 0 : index
    %22 = vector.load %arg7[%c2, %c0_26] : memref<18x72xf32, #tpu.memory_space<vmem>>, vector<16x72xf32>
    %23 = tpu.concatenate %20, %21, %22 in 1 : vector<16x72xf32>, vector<16x72xf32>, vector<16x72xf32> -> vector<16x216xf32>
    %24 = arith.truncf %23 : vector<16x216xf32> to vector<16x216xbf16>
    %c0_27 = arith.constant 0 : index
    %c0_28 = arith.constant 0 : index
    %25 = vector.load %arg2[%c0_27, %c0_28] : memref<216x128xbf16, #tpu.memory_space<vmem>>, vector<216x128xbf16>
    %cst_29 = arith.constant dense<0.000000e+00> : vector<16x128xf32>
    %26 = tpu.matmul %24, %25, %cst_29 {dimension_numbers = #tpu.dot_dimension_numbers<[1], [0], [0], [1], [0, 0, 1, 1], [], []>} : vector<16x216xbf16>, vector<216x128xbf16>, vector<16x128xf32> -> vector<16x128xf32>
    %c0_30 = arith.constant 0 : index
    %c0_31 = arith.constant 0 : index
    %27 = vector.load %arg3[%c0_30, %c0_31] : memref<1x128xf32, #tpu.memory_space<vmem>>, vector<1x128xf32>
    %28 = vector.broadcast %27 : vector<1x128xf32> to vector<16x128xf32>
    %29 = arith.addf %26, %28 : vector<16x128xf32>
    %c1_32 = arith.constant 1 : index
    %c8 = arith.constant 8 : index
    %30 = vector.load %arg8[%c1_32, %c8] : memref<18x144xf32, #tpu.memory_space<vmem>>, vector<16x128xf32>
    tpu.vector_store %arg8[%c1_32, %c8], %29 {strides = array<i32>} : memref<18x144xf32, #tpu.memory_space<vmem>>, vector<16x128xf32>,
    %c0_33 = arith.constant 0 : index
    %c0_34 = arith.constant 0 : index
    %31 = vector.load %arg8[%c0_33, %c0_34] : memref<18x144xf32, #tpu.memory_space<vmem>>, vector<16x144xf32>
    %c1_35 = arith.constant 1 : index
    %c0_36 = arith.constant 0 : index
    %32 = vector.load %arg8[%c1_35, %c0_36] : memref<18x144xf32, #tpu.memory_space<vmem>>, vector<16x144xf32>
    %c2_37 = arith.constant 2 : index
    %c0_38 = arith.constant 0 : index
    %33 = vector.load %arg8[%c2_37, %c0_38] : memref<18x144xf32, #tpu.memory_space<vmem>>, vector<16x144xf32>
    %34 = tpu.concatenate %31, %32, %33 in 1 : vector<16x144xf32>, vector<16x144xf32>, vector<16x144xf32> -> vector<16x432xf32>
    %35 = arith.truncf %34 : vector<16x432xf32> to vector<16x432xbf16>
    %c0_39 = arith.constant 0 : index
    %c0_40 = arith.constant 0 : index
    %36 = vector.load %arg4[%c0_39, %c0_40] : memref<432x128xbf16, #tpu.memory_space<vmem>>, vector<432x128xbf16>
    %cst_41 = arith.constant dense<0.000000e+00> : vector<16x128xf32>
    %37 = tpu.matmul %35, %36, %cst_41 {dimension_numbers = #tpu.dot_dimension_numbers<[1], [0], [0], [1], [0, 0, 1, 1], [], []>} : vector<16x432xbf16>, vector<432x128xbf16>, vector<16x128xf32> -> vector<16x128xf32>
    %c0_42 = arith.constant 0 : index
    %c0_43 = arith.constant 0 : index
    %38 = vector.load %arg5[%c0_42, %c0_43] : memref<1x128xf32, #tpu.memory_space<vmem>>, vector<1x128xf32>
    %39 = vector.broadcast %38 : vector<1x128xf32> to vector<16x128xf32>
    %40 = arith.addf %37, %39 : vector<16x128xf32>
    %cst_44 = arith.constant 0.000000e+00 : f32
    %41 = vector.broadcast %cst_44 : f32 to vector<16x128xf32>
    %42 = arith.maximumf %40, %41 : vector<16x128xf32>
    %c0_45 = arith.constant 0 : index
    %c0_46 = arith.constant 0 : index
    %c0_47 = arith.constant 0 : index
    %43 = vector.load %arg6[%c0_45, %c0_46, %c0_47] : memref<1x16x128xf32, #tpu.memory_space<vmem>>, vector<1x16x128xf32>
    %44 = vector.shape_cast %43 : vector<1x16x128xf32> to vector<16x128xf32>
    %45 = vector.shape_cast %42 : vector<16x128xf32> to vector<1x16x128xf32>
    tpu.vector_store %arg6[%c0_45, %c0_46, %c0_47], %45 {strides = array<i32>} : memref<1x16x128xf32, #tpu.memory_space<vmem>>, vector<1x16x128xf32>,
    return
  }
  func.func @transform_0(%arg0: i32) -> (i32, i32, i32) {
    %c0_i32 = arith.constant 0 : i32
    %c0_i32_0 = arith.constant 0 : i32
    %c0_i32_1 = arith.constant 0 : i32
    return %arg0, %c0_i32, %c0_i32_0 : i32, i32, i32
  }
  func.func @transform_1(%arg0: i32) -> (i32, i32) {
    %c0_i32 = arith.constant 0 : i32
    %c0_i32_0 = arith.constant 0 : i32
    %c0_i32_1 = arith.constant 0 : i32
    return %c0_i32, %c0_i32_0 : i32, i32
  }
  func.func @transform_2(%arg0: i32) -> (i32, i32) {
    %c0_i32 = arith.constant 0 : i32
    %c0_i32_0 = arith.constant 0 : i32
    %c0_i32_1 = arith.constant 0 : i32
    return %c0_i32, %c0_i32_0 : i32, i32
  }
  func.func @transform_3(%arg0: i32) -> (i32, i32) {
    %c0_i32 = arith.constant 0 : i32
    %c0_i32_0 = arith.constant 0 : i32
    %c0_i32_1 = arith.constant 0 : i32
    return %c0_i32, %c0_i32_0 : i32, i32
  }
  func.func @transform_4(%arg0: i32) -> (i32, i32) {
    %c0_i32 = arith.constant 0 : i32
    %c0_i32_0 = arith.constant 0 : i32
    %c0_i32_1 = arith.constant 0 : i32
    return %c0_i32, %c0_i32_0 : i32, i32
  }
  func.func @transform_5(%arg0: i32) -> (i32, i32, i32) {
    %c0_i32 = arith.constant 0 : i32
    %c0_i32_0 = arith.constant 0 : i32
    %c0_i32_1 = arith.constant 0 : i32
    return %arg0, %c0_i32, %c0_i32_0 : i32, i32, i32
  }
}

</mosaic_0001>

<bundles_post_ra>
// kernel: tpu_custom_call.1
= control target key start
LH: loop header
LB: loop body
LE: loop exit
PB: predicated region body
PF: predicated region fallthrough
CT: control target
= control target key end

     0   :  { %10 = vsyncpa [#allocation5], 0  ;;  %s1805_s0 = inlined_call_operand.hbm [shape: bf16[2,16,64], index: 0, kind: input, shape index: {}]   ;;  %s1806_s1 = inlined_call_operand.hbm [shape: bf16[216,128], index: 1, kind: input, shape index: {}]   ;;  %s1807_s2 = inlined_call_operand.vmem [shape: f32[1,128], index: 2, kind: input, shape index: {}]   ;;  %s1808_s3 = inlined_call_operand.hbm [shape: bf16[432,128], index: 3, kind: input, shape index: {}]   ;;  %s1809_s4 = inlined_call_operand.vmem [shape: f32[1,128], index: 4, kind: input, shape index: {}]   ;;  %s1810_s5 = inlined_call_operand.hbm [shape: f32[2,16,128], index: 5, kind: output, shape index: {}]  }
   0x1   :  { %12 = vsyncpa [#allocation5 + $0x1], 0 }
   0x2   :  { %13 = vsyncpa [#allocation8], 0 }
   0x3   :  { %14 = vsyncpa [#allocation6], 0 }
   0x4   :  { %16 = vsyncpa [#allocation6 + $0x1], 0  ;;  %s1486_s18 = smov 0   ;;  %s1488_s19 = smov 0  }
   0x5   :  { %s1490_s20 = smov 0   ;;  %s1492_s21 = smov 0  }
   0x6 LB: > { %s1507_s22 = sadd.s32 4294967295, %s1440_s21   ;;  %s1040_s23 = sadd.s32 4294967294, %s1440_s21   ;;  %s1440_s21 = sphi %s1492_s21, %s1830_s21   ;;  %s1436_s20 = sphi %s1490_s20, %s1829_s20   ;;  %s1432_s19 = sphi %s1488_s19, %s1828_s19   ;;  %s1428_s18 = sphi %s1486_s18, %s1827_s18  }
   0x7   : > { %p42_p0 = scmp.ne.s32.totalorder %s1432_s19, %s1428_s18  ;;  %p1811_p1 = scmp.eq.s32.totalorder %s1507_s22, 0 }
   0x8   : > { %p156_p3 = scmp.eq.s32.totalorder %s1040_s23, 1  ;;  %p1041_p5 = scmp.ge.s32.totalorder %s1440_s21, 1 }
   0x9   : > { %p1516_p4 = por %p1811_p1, %p42_p0  ;;  %p163_p7 = scmp.lt.s32.totalorder %s1440_s21, 3 }
   0xa   : > { %p1521_p6 = por %p156_p3, %p42_p0  ;;  %s1442_s27 = smov [#allocation7]  }
   0xb   : > { %s1814_s24 = scalar_select %p1516_p4, 1, 0 }
   0xc   : > { %s1815_s25 = scalar_select %p1521_p6, 1, 0 }
   0xd   : > { %p1526_p8 = pnand %p1041_p5, %p163_p7  ;;  %s175_s28 = sshll.u32 %s1442_s27, 4  ;;  %s1530_s28 = int_to_ptr.vmem [resolvable:$true] %s175_s28 }
   0xe   : > { %s1443_s30 = smov [#allocation9]   ;;  %s1284_s9 = scalar_lea.hbm %s1806_s1, 1728 }
   0xf   : > { %p1143_p9 = pneg %p1526_p8  ;;  %s191_s6 = sshll.u32 %s1443_s30, 4  ;;  %s1541_s6 = int_to_ptr.vmem [resolvable:$true] %s191_s6 }
  0x10   : > { %p1285_p12 = scmp.ne.s32.totalorder %s1806_s1, %s1284_s9  ;;  %p1291_p5 = scmp.lt.u32.totalorder %s1284_s9, %s1806_s1 }
  0x11   : > { %p1537_p11 = pnand %p1143_p9, %p1811_p1 }
  0x13   : > { %p1286_p13 = pneg %p1537_p11 }
  0x15   : > { %p1287_p0 = pnand %p1286_p13, %p1285_p12 }
  0x17   : > { %p1288_p3 = pneg %p1287_p0 }
  0x19   : > { %p1293_p7 = pnand %p1291_p5, %p1288_p3 }
  0x1b   : > { %1296 = shalt.err (!%p1293_p7)
}
  0x1c   : > { %s1297_s14 = scalar_lea.vmem %s1530_s28, 1728  ;;  %p1305_p2 = scmp.lt.s32.totalorder %s1530_s28, %s1530_s28 }
  0x1d   : > { %p1298_p9 = scmp.ne.s32.totalorder %s1530_s28, %s1297_s14  ;;  %p1306_p12 = scmp.lt.s32.totalorder %s1297_s14, %s1297_s14 }
  0x1f   : > { %p1300_p10 = pnand %p1298_p9, %p1286_p13  ;;  %p1307_p0 = por %p1306_p12, %p1305_p2 }
  0x21   : > { %p1301_p1 = pneg %p1300_p10 }
  0x23   : > { %p1308_p6 = pnand %p1307_p0, %p1301_p1 }
  0x25   : > { %1311 = shalt.err (!%p1308_p6)
}
  0x26   : > { %s1444_s15 = smov 64   ;;  %s1445_s16 = smov 4  }
  0x27   : > { %1146 = dma.hbm_to_vmem [thread:$0]  (!%p1537_p11), %s1806_s1, 1728, %s1530_s28, [#allocation8], %s1444_s15, %s1444_s15, %s1445_s16  }
  0x28   : > { %s1312_s7 = scalar_lea.hbm %s1808_s3, 3456 }
  0x29   : > { %p1313_p1 = scmp.ne.s32.totalorder %s1808_s3, %s1312_s7  ;;  %p1319_p10 = scmp.lt.u32.totalorder %s1312_s7, %s1808_s3 }
  0x2b   : > { %p1315_p2 = pnand %p1313_p1, %p1286_p13 }
  0x2d   : > { %p1316_p6 = pneg %p1315_p2 }
  0x2f   : > { %p1321_p3 = pnand %p1319_p10, %p1316_p6 }
  0x31   : > { %1324 = shalt.err (!%p1321_p3)
}
  0x32   : > { %s1325_s28 = scalar_lea.vmem %s1541_s6, 3456  ;;  %p1333_p12 = scmp.lt.s32.totalorder %s1541_s6, %s1541_s6 }
  0x33   : > { %p1326_p5 = scmp.ne.s32.totalorder %s1541_s6, %s1325_s28  ;;  %p1334_p0 = scmp.lt.s32.totalorder %s1325_s28, %s1325_s28 }
  0x35   : > { %p1328_p7 = pnand %p1326_p5, %p1286_p13  ;;  %p1335_p1 = por %p1334_p0, %p1333_p12 }
  0x37   : > { %p1329_p9 = pneg %p1328_p7 }
  0x39   : > { %p1336_p2 = pnand %p1335_p1, %p1329_p9 }
  0x3b   : > { %1339 = shalt.err (!%p1336_p2)
}
  0x3c   : > { %1149 = dma.hbm_to_vmem [thread:$0]  (!%p1537_p11), %s1808_s3, 3456, %s1541_s6, [#allocation8], %s1444_s15, %s1444_s15, %s1445_s16  }
  0x3d   : > { %s1602_s29 = sadd.s32 1, %s1440_s21   ;;  %s29_s14 = sadd.s32 1, %s1436_s20 }
  0x3e   : > { %s26_s17 = ssub.s32 %s1440_s21, %s1602_s29  ;;  %p36_p13 = scmp.ne.s32.totalorder %s1436_s20, %s1432_s19 }
  0x3f   : > { %p27_p6 = scmp.eq.s32.totalorder %s26_s17, 0  ;;  %p37_p10 = scmp.eq.s32.totalorder %s1440_s21, 0 }
  0x40   : > { %p1818_p3 = scmp.eq.s32.totalorder %s1507_s22, 1  ;;  %p1160_p7 = scmp.lt.s32.totalorder %s1440_s21, 2 }
  0x41   : > { %s1618_s27 = scalar_select %p27_p6, %s1436_s20, %s29_s14  }
  0x42   : > { %p1612_p5 = por %p1818_p3, %p36_p13  ;;  %p38_p9 = por %p37_p10, %p36_p13 }
  0x43   : > { %s208_s30 = sand.u32 1, %s1436_s20   ;;  %s1103_s6 = sshll.u32 %s1440_s21, 7 }
  0x44   : > { %s1819_s23 = scalar_select %p1612_p5, 1, 0 }
  0x45   : > { %s1045_s7 = sshll.u32 %s208_s30, 3  ;;  %s1625_s10 = scalar_lea.hbm %s1805_s0, %s1103_s6 }
  0x46   : > { %s212_s11 = scalar_lea.vmem [#allocation4], %s1045_s7  ;;  %p1629_p11 = pnand %p1160_p7, %p38_p9 }
  0x47   : > { %s219_s28 = sshll.u32 %s212_s11, 4  ;;  %s1633_s13 = scalar_lea.sflag [#allocation5], %s208_s30  ;;  %s1627_s28 = int_to_ptr.vmem [resolvable:$true] %s219_s28 }
  0x48   : > { %s1340_s14 = scalar_lea.hbm %s1625_s10, 128  ;;  %p1342_p0 = pneg %p1629_p11 }
  0x49   : > { %p1341_p12 = scmp.ne.s32.totalorder %s1625_s10, %s1340_s14  ;;  %s1345_s6 = scalar_lea.hbm %s1805_s0, 256 }
  0x4a   : > { %p1346_p13 = scmp.lt.u32.totalorder %s1625_s10, %s1805_s0  ;;  %p1347_p6 = scmp.lt.u32.totalorder %s1345_s6, %s1340_s14 }
  0x4b   : > { %p1343_p1 = pnand %p1342_p0, %p1341_p12  ;;  %p1349_p3 = scmp.lt.u32.totalorder %s1340_s14, %s1625_s10 }
  0x4c   : > { %p1348_p10 = por %p1347_p6, %p1346_p13 }
  0x4d   : > { %p1344_p2 = pneg %p1343_p1 }
  0x4e   : > { %p1350_p7 = por %p1349_p3, %p1348_p10 }
  0x50   : > { %p1351_p9 = pnand %p1350_p7, %p1344_p2 }
  0x52   : > { %1354 = shalt.err (!%p1351_p9)
}
  0x53   : > { %s1355_s30 = scalar_lea.vmem %s1627_s28, 128  ;;  %s1446_s11 = smov [#allocation4]  }
  0x54   : > { %p1356_p12 = scmp.ne.s32.totalorder %s1627_s28, %s1355_s30  ;;  %s1360_s17 = sshll.u32 %s1446_s11, 4  ;;  %s1361_s17 = int_to_ptr.vmem [resolvable:$false] %s1360_s17 }
  0x55   : > { %s1362_s7 = scalar_lea.vmem %s1361_s17, 256  ;;  %p1363_p4 = scmp.lt.s32.totalorder %s1627_s28, %s1361_s17 }
  0x56   : > { %p1358_p1 = pnand %p1356_p12, %p1342_p0  ;;  %p1364_p13 = scmp.lt.s32.totalorder %s1362_s7, %s1355_s30 }
  0x58   : > { %p1359_p5 = pneg %p1358_p1  ;;  %p1365_p6 = por %p1364_p13, %p1363_p4 }
  0x5a   : > { %p1366_p10 = pnand %p1365_p6, %p1359_p5 }
  0x5c   : > { %1369 = shalt.err (!%p1366_p10)
}
  0x5d   : > { %1153 = dma.hbm_to_vmem [thread:$0]  (!%p1629_p11), %s1625_s10, 128, %s1627_s28, %s1633_s13, %s1444_s15, %s1444_s15, %s1445_s16  }
  0x5e   : > { %231 = sbr.rel (%p1526_p8) target bundleno = 1106 (0x452), region = 40  ;;  %s1667_s14 = sand.u32 (!%p1526_p8), 1, %s1432_s19  }
  0x5f   : > { %s1049_s6 = sshll.u32 (!%p1526_p8), %s1667_s14, 3  ;;  %s234_s8 = scalar_lea.sflag (!%p1526_p8), [#allocation5], %s1667_s14 }
  0x60   : > { %s237_s9 = scalar_lea.vmem (!%p1526_p8), [#allocation4], %s1049_s6  ;;  %p1821_p4 = scmp.ne.s32.totalorder (!%p1526_p8), %s1814_s24, 0 }
  0x65   : > { %1415 = dma.done.wait (%p1821_p4), %s234_s8, 128  }
  0x66   : > { %1417 = vsyncadd (%p1821_p4), %s234_s8, 4294967168  ;;  %p1822_p5 = scmp.eq.s32.totalorder %s1507_s22, 0 }
  0x68   : > { %1419 = dma.done.wait (%p1822_p5), [#allocation8], 5184   ;;  %p1823_p11 = pmov %p1822_p5 }
  0x69   : > { %vm273_vm0 = vcmask 581632   ;;  %vm276_vm1 = vcmask 31744   ;;  %vm279_vm2 = vcmask 25600   ;;  %vm281_vm3 = vcmask 589344   ;;  %v1106_v1 = vld [vmem:[%s237_s9] sm:$0xff]   ;;  %s1448_s24 = smov 4  }
  0x6a   : > { %1421 = vsyncadd (%p1823_p11), [#allocation8], 4294962112  ;;  %vm284_vm4 = vcmask 583200   ;;  %v1447_v0 = vmov 0.0   ;;  %v1107_v2 = vunpack.c.l.bf16 %v1106_v1  ;;  %v1108_v3 = vunpack.c.h.bf16 %v1106_v1  ;;  %v1243_v5 = vld [vmem:[#allocation7] sm:$0xff]   ;;  %v1244_v7 = vld [vmem:[#allocation7 + $0x8] sm:$0xff]  }
  0x6b   : > { %274 = vst.msk [vmem:[#allocation2] sm:$0x1] %vm273_vm0, %v1447_v0  ;;  %275 = vst.msk [vmem:[#allocation2 + $0x11] sm:$0x1] %vm273_vm0, %v1447_v0  ;;  %v1449_v6 = vmov 0   ;;  %v1245_v8 = vld [vmem:[#allocation7 + $0x10] sm:$0xff]   ;;  %v286_v44 = vlaneseq }
  0x6c   : > { %278 = vst.msk [vmem:[#allocation2 + $0x8] sm:$0xff] %vm276_vm1, %v1447_v0  ;;  %277 = vst.msk [vmem:[#allocation2] sm:$0xff] %vm276_vm1, %v1447_v0  ;;  %v1208_v4 = vpack.i.bf16 %v1108_v3, %v1107_v2  ;;  %473 = vmatprep.subr.bf16.mxu0 %v1449_v6  ;;  %v1246_v9 = vld [vmem:[#allocation7 + $0x18] sm:$0xff]   ;;  %v1247_v10 = vld [vmem:[#allocation7 + $0x20] sm:$0xff]   ;;  %vm317_vm5 = vcmask 556064   ;;  %vm469_vm6 = vcmask 1043456  }
  0x6d   : > { %280 = vst.msk [vmem:[#allocation2 + $0x10] sm:$0x3] %vm279_vm2, %v1447_v0  ;;  %474 = vmatpush1.bf16.msra.mxu0 %v1243_v5  ;;  %v1248_v11 = vld [vmem:[#allocation7 + $0x28] sm:$0xff]   ;;  %v1249_v12 = vld [vmem:[#allocation7 + $0x30] sm:$0xff]   ;;  %v1250_v13 = vld [vmem:[#allocation7 + $0x38] sm:$0xff]   ;;  %s1450_s26 = smov 16  }
  0x6e   : > { %283 = vst.msk [vmem:[#allocation2 + $0x8] sm:$0xff] %vm281_vm3, %v1447_v0  ;;  %282 = vst.msk [vmem:[#allocation2] sm:$0xff] %vm281_vm3, %v1447_v0  ;;  %1209 = vrot.lane.b32.xlu0 %v1208_v4, %s1448_s24  ;;  %475 = vmatprep.subr.bf16.mxu0 %v1449_v6  ;;  %v1251_v14 = vld [vmem:[#allocation7 + $0x40] sm:$0xff]   ;;  %v1252_v15 = vld [vmem:[#allocation7 + $0x48] sm:$0xff]   ;;  %s1451_s15 = smov 72   ;;  %vm345_vm7 = vcmask 130048  }
  0x6f   : > { %285 = vst.msk [vmem:[#allocation2 + $0x10] sm:$0x3] %vm284_vm4, %v1447_v0  ;;  %v1253_v16 = vld [vmem:[#allocation7 + $0x50] sm:$0xff]   ;;  %v1254_v17 = vld [vmem:[#allocation7 + $0x58] sm:$0xff]   ;;  %v1255_v18 = vld [vmem:[#allocation7 + $0x60] sm:$0xff]   ;;  %vm342_vm8 = vcmask 588800  }
  0x70   : > { %v1256_v22 = vld [vmem:[#allocation7 + $0x68] ss:$0 sps:$4 sm:$0xff]   ;;  %vm465_vm9 = vcmask 719872   ;;  %vm295_vm10 = vcmask 64512   ;;  %vm300_vm11 = vcmask 130112   ;;  %vm288_vm12 = vcmp.lt.s32.totalorder %v286_v44, 144 }
  0x71   : > { %476 = vmatpush1.bf16.msra.mxu0 %v1244_v7  ;;  %v471_v23 = vsel %vm469_vm6, %v1256_v22, 0  ;;  %297 = vst.msk [vmem:[#allocation3 + $0x10] sm:$0xff] %vm295_vm10, %v1447_v0  ;;  %vm298_vm13 = vcmask 58368   ;;  %vm303_vm14 = vcmask 123968   ;;  %v1053_v45 = vld [vmem:[%s1807_s2] ss:$0 sm:$0xff] }
  0x72   : > { %477 = vmatprep.subr.bf16.mxu0 %v1449_v6  ;;  %302 = vst.msk [vmem:[#allocation3 + $0x18] sm:$0xff] %vm300_vm11, %v1447_v0  ;;  %vm516_vm15 = vcmask 1040384   ;;  %s1452_s28 = smov 8   ;;  %v1257_v55 = vld [vmem:[#allocation9 + $0x40] sm:$0xff]   ;;  %v1259_v57 = vld [vmem:[#allocation9 + $0x48] sm:$0xff]   ;;  %v1261_v59 = vld [vmem:[#allocation9 + $0x50] sm:$0xff]  }
  0x73   : > { %290 = vst.msk [vmem:[#allocation3] ss:$8 sm:$0x3] %vm288_vm12, %v1447_v0  ;;  %293 = vst.msk [vmem:[#allocation3 + $0x21] ss:$8 sm:$0x3] %vm288_vm12, %v1447_v0  ;;  %1109 = vmatprep.subr.bf16.mxu1 %v1257_v55 }
  0x74   : > { %296 = vst.msk [vmem:[#allocation3] sm:$0xff] %vm295_vm10, %v1447_v0  ;;  %v1258_v56 = vld [vmem:[#allocation9] sm:$0xff]   ;;  %v1260_v58 = vld [vmem:[#allocation9 + $0x8] sm:$0xff]   ;;  %v1262_v60 = vld [vmem:[#allocation9 + $0x10] sm:$0xff]   ;;  %vm529_vm0 = vcmask 1047617   ;;  %vm531_vm1 = vcmask 64513  }
  0x75   : > { %478 = vmatpush1.bf16.msra.mxu0 %v1245_v8  ;;  %301 = vst.msk [vmem:[#allocation3 + $0x8] sm:$0xff] %vm300_vm11, %v1447_v0  ;;  %1110 = vmatpush3.bf16.msra.mxu1 %v1258_v56  ;;  %v1263_v61 = vld [vmem:[#allocation9 + $0x58] sm:$0xff]   ;;  %v1265_v63 = vld [vmem:[#allocation9 + $0x60] sm:$0xff]   ;;  %v1267_v1 = vld [vmem:[#allocation9 + $0x68] sm:$0xff]   ;;  %vm533_vm2 = vcmask 1047616   ;;  %vm536_vm3 = vcmask 1040448  }
  0x76   : > { %479 = vmatprep.subr.bf16.mxu0 %v1449_v6  ;;  %299 = vst.msk [vmem:[#allocation3 + $0x20] sm:$0x3] %vm298_vm13, %v1447_v0  ;;  %1111 = vmatprep.subr.bf16.mxu1 %v1259_v57  ;;  %v1264_v62 = vld [vmem:[#allocation9 + $0x18] sm:$0xff]   ;;  %v1268_v2 = vld [vmem:[#allocation9 + $0x28] sm:$0xff]   ;;  %v1269_v3 = vld [vmem:[#allocation9 + $0x70] sm:$0xff]   ;;  %vm538_vm4 = vcmask 57344  }
  0x77   : > { %304 = vst.msk [vmem:[#allocation3 + $0x28] sm:$0x3] %vm303_vm14, %v1447_v0  ;;  %v1266_v0 = vld [vmem:[#allocation9 + $0x20] sm:$0xff]   ;;  %v1270_v4 = vld [vmem:[#allocation9 + $0x30] sm:$0xff]   ;;  %vm587_vm6 = vcmask 1045504   ;;  %s1453_s12 = smov 32  }
  0x78   : > { %v1273_v57 = vld [vmem:[#allocation9 + $0x80] sm:$0xff]   ;;  %s1052_s13 = sshll.u32 %s1667_s14, 4  ;;  %s1104_s6 = sshll.u32 %s1507_s22, 8 }
  0x79   : > { %480 = vmatpush1.bf16.msra.mxu0 %v1246_v9  ;;  %1112 = vmatpush3.bf16.msra.mxu1 %v1260_v58  ;;  %v1271_v9 = vld [vmem:[#allocation9 + $0x78] sm:$0xff]   ;;  %s271_s17 = scalar_lea.vmem [#allocation10], %s1052_s13  ;;  %s1760_s24 = scalar_lea.hbm %s1810_s5, %s1104_s6 }
  0x7a   : > { %481 = vmatprep.subr.bf16.mxu0 %v1449_v6  ;;  %1113 = vmatprep.subr.bf16.mxu1 %v1261_v59  ;;  %s948_s7 = sshll.u32 %s271_s17, 4  ;;  %p1824_p0 = scmp.ne.s32.totalorder %s1819_s23, 0  ;;  %s1755_s7 = int_to_ptr.vmem [resolvable:$true] %s948_s7 }
  0x7b   : > { %s1454_s22 = smov [#allocation10]  }
  0x7c   : > { %s1374_s16 = sshll.u32 %s1454_s22, 4  ;;  %s1375_s16 = int_to_ptr.vmem [resolvable:$false] %s1374_s16 }
  0x7d   : > { %482 = vmatpush1.bf16.msra.mxu0 %v1247_v10  ;;  %1114 = vmatpush3.bf16.msra.mxu1 %v1262_v60  ;;  %v1272_v10 = vld [vmem:[#allocation9 + $0x38] sm:$0xff]   ;;  %s1376_s10 = scalar_lea.vmem %s1375_s16, 512  ;;  %p1377_p7 = scmp.lt.s32.totalorder %s1755_s7, %s1375_s16 }
  0x7e   : > { %483 = vmatprep.subr.bf16.mxu0 %v1449_v6  ;;  %1115 = vmatprep.subr.bf16.mxu1 %v1263_v61 }
  0x81   : > { %484 = vmatpush1.bf16.msra.mxu0 %v1248_v11  ;;  %1116 = vmatpush3.bf16.msra.mxu1 %v1264_v62 }
  0x82   : > { %485 = vmatprep.subr.bf16.mxu0 %v1449_v6  ;;  %1117 = vmatprep.subr.bf16.mxu1 %v1265_v63 }
  0x85   : > { %486 = vmatpush1.bf16.msra.mxu0 %v1249_v12  ;;  %1118 = vmatpush3.bf16.msra.mxu1 %v1266_v0 }
  0x86   : > { %487 = vmatprep.subr.bf16.mxu0 %v1449_v6  ;;  %1119 = vmatprep.subr.bf16.mxu1 %v1267_v1  ;;  %v1274_v1 = vld [vmem:[#allocation9 + $0x88] sm:$0xff]  }
  0x89   : > { %488 = vmatpush1.bf16.msra.mxu0 %v1250_v13  ;;  %1120 = vmatpush3.bf16.msra.mxu1 %v1268_v2  ;;  %v1275_v2 = vld [vmem:[#allocation9 + $0x90] sm:$0xff]  }
  0x8a   : > { %489 = vmatprep.subr.bf16.mxu0 %v1449_v6  ;;  %1121 = vmatprep.subr.bf16.mxu1 %v1269_v3  ;;  %v1276_v3 = vld [vmem:[#allocation9 + $0x98] sm:$0xff]  }
  0x8d   : > { %490 = vmatpush1.bf16.msra.mxu0 %v1251_v14  ;;  %1122 = vmatpush3.bf16.msra.mxu1 %v1270_v4  ;;  %v1277_v4 = vld [vmem:[#allocation9 + $0xa0] sm:$0xff]  }
  0x8e   : > { %491 = vmatprep.subr.bf16.mxu0 %v1449_v6  ;;  %1123 = vmatprep.subr.bf16.mxu1 %v1271_v9  ;;  %v1281_v9 = vld [vmem:[#allocation9 + $0xc0] sm:$0xff]  }
  0x91   : > { %492 = vmatpush1.bf16.msra.mxu0 %v1252_v15  ;;  %1124 = vmatpush3.bf16.msra.mxu1 %v1272_v10  ;;  %v1282_v10 = vld [vmem:[#allocation9 + $0xc8] sm:$0xff]  }
  0x92   : > { %493 = vmatprep.subr.bf16.mxu0 %v1449_v6  ;;  %889 = vmatprep.subr.bf16.mxu1 %v1449_v6 }
  0x95   : > { %494 = vmatpush1.bf16.msra.mxu0 %v1253_v16 }
  0x96   : > { %495 = vmatprep.subr.bf16.mxu0 %v1449_v6 }
  0x99   : > { %496 = vmatpush1.bf16.msra.mxu0 %v1254_v17 }
  0x9a   : > { %497 = vmatprep.subr.bf16.mxu0 %v1449_v6 }
  0x9d   : > { %498 = vmatpush1.bf16.msra.mxu0 %v1255_v18 }
  0x9e   : > { %499 = vmatprep.subr.bf16.mxu0 %v1449_v6 }
  0xa1   : > { %500 = vmatpush1.bf16.msra.mxu0 %v471_v23 }
  0xe0   : > { %v1210_v19 = vpop.permute.xlu0 %1209 }
  0xe1   : > { %v1212_v20 = vunpack.i.h.bf16 %v1210_v19  ;;  %v1211_v21 = vunpack.i.l.bf16 %v1210_v19 }
  0xe3   : > { %318 = vst.msk [vmem:[#allocation2 + $0x1] sm:$0xff] %vm317_vm5, %v1211_v21  ;;  %319 = vst.msk [vmem:[#allocation2 + $0x9] sm:$0xff] %vm317_vm5, %v1212_v20  ;;  %vm558_vm5 = vcmask 1046528  }
  0xea   : > { %v324_v24 = vld [vmem:[#allocation2 + $0x2] sm:$0xff]  ;;  %v325_v25 = vld [vmem:[#allocation2 + $0xa] sm:$0xff] }
  0xeb   : > { %v322_v26 = vld [vmem:[#allocation2 + $0x1] sm:$0xff]  ;;  %v1218_v27 = vpack.i.bf16 %v325_v25, %v324_v24  ;;  %v323_v28 = vld [vmem:[#allocation2 + $0x9] sm:$0xff] }
  0xec   : > { %v1213_v29 = vpack.i.bf16 %v323_v28, %v322_v26  ;;  %v320_v36 = vld [vmem:[#allocation2] sm:$0xff]  ;;  %v321_v37 = vld [vmem:[#allocation2 + $0x8] sm:$0xff] }
  0xed   : > { %1219 = vrot.lane.b32.xlu1 %v1218_v27, %s1450_s26 }
  0xee   : > { %1214 = vrot.lane.b32.xlu0 %v1213_v29, %s1451_s15  ;;  %s1370_s15 = scalar_lea.vmem %s1755_s7, 256 }
  0xef   : > { %p1371_p8 = scmp.ne.s32.totalorder %s1755_s7, %s1370_s15  ;;  %p1378_p9 = scmp.lt.s32.totalorder %s1376_s10, %s1370_s15 }
  0xf1   : > { %p1372_p2 = pnand %p1371_p8, %p1824_p0  ;;  %p1379_p12 = por %p1378_p9, %p1377_p7 }
  0xf3   : > { %p1373_p3 = pneg %p1372_p2 }
  0xf5   : > { %p1380_p1 = pnand %p1379_p12, %p1373_p3 }
 0x15f   : > { %v1220_v30 = vpop.permute.xlu1 %1219 }
 0x160   : > { %v1222_v31 = vunpack.i.h.bf16 %v1220_v30  ;;  %v1221_v32 = vunpack.i.l.bf16 %v1220_v30  ;;  %v1215_v33 = vpop.permute.xlu0 %1214 }
 0x161   : > { %v1217_v34 = vunpack.i.h.bf16 %v1215_v33  ;;  %v1216_v35 = vunpack.i.l.bf16 %v1215_v33 }
 0x163   : > { %v346_v38 = vsel %vm345_vm7, %v1216_v35, %v1221_v32  ;;  %v347_v39 = vsel %vm345_vm7, %v1217_v34, %v1222_v31  ;;  %v343_v40 = vsel %vm342_vm8, %v320_v36, %v1216_v35  ;;  %v344_v41 = vsel %vm342_vm8, %v321_v37, %v1217_v34 }
 0x164   : > { %v349_v42 = vpack.c.bf16 %v347_v39, %v346_v38  ;;  %v348_v43 = vpack.c.bf16 %v344_v41, %v343_v40  ;;  %vm606_vm8 = vcmask 261120  }
 0x166   : > { %1068 = vmatprep.mubr.msk.bf16.mxu0 %vm465_vm9, %v349_v42  ;;  %vm844_vm9 = vcmask 392192  }
 0x167   : > { %506 = vmatmul.mubr.bf16.vlgmr.msra.gmra.mrb[0].mxu0 %v348_v43 }
 0x23a   : > { %v507_v46 = vpop.f32.mrb[0].mxu0 }
 0x23b   : > { %v508_v47 = vadd.f32 %v1053_v45, %v507_v46  ;;  %v509_v48 = vpop.f32.mrb[1].mxu0 }
 0x23c   : > { %v510_v49 = vpop.f32.mrb[2].mxu0 }
 0x23d   : > { %v517_v50 = vrot.slane %v508_v47, 7  ;;  %v511_v51 = vadd.f32 %v1053_v45, %v510_v49  ;;  %v512_v52 = vpop.f32.mrb[3].mxu0 }
 0x23f   : > { %v518_v53 = vrot.slane %v511_v51, 7  ;;  %520 = vrot.lane.b32.xlu1 %v517_v50, %s1452_s28 }
 0x241   : > { %v519_v54 = vsel %vm516_vm15, %v517_v50, %v518_v53 }
 0x242   : > { %522 = vrot.lane.b32.xlu0 %v519_v54, %s1452_s28 }
 0x243   : > { %524 = vrot.lane.b32.xlu1 %v518_v53, %s1452_s28 }
 0x2b1   : > { %v521_v5 = vpop.permute.xlu1 %520 }
 0x2b2   : > { %530 = vst.msk [vmem:[#allocation3] sm:$0xfe] %vm529_vm0, %v521_v5 }
 0x2b3   : > { %532 = vst.msk [vmem:[#allocation3 + $0x8] sm:$0xfe] %vm531_vm1, %v521_v5  ;;  %v1278_v5 = vld [vmem:[#allocation9 + $0xa8] sm:$0xff]  }
 0x2b4   : > { %v523_v7 = vpop.permute.xlu0 %522 }
 0x2b5   : > { %534 = vst.msk [vmem:[#allocation3 + $0x10] sm:$0xff] %vm533_vm2, %v523_v7  ;;  %v525_v8 = vpop.permute.xlu1 %524 }
 0x2b6   : > { %535 = vst.msk [vmem:[#allocation3 + $0x18] sm:$0xff] %vm295_vm10, %v523_v7  ;;  %v1279_v7 = vld [vmem:[#allocation9 + $0xb0] sm:$0xff]  }
 0x2b7   : > { %537 = vst.msk [vmem:[#allocation3 + $0x20] sm:$0x1] %vm536_vm3, %v525_v8 }
 0x2b8   : > { %539 = vst.msk [vmem:[#allocation3 + $0x28] sm:$0x1] %vm538_vm4, %v525_v8  ;;  %v1280_v8 = vld [vmem:[#allocation9 + $0xb8] sm:$0xff]  }
 0x2b9   : > { %v544_v12 = vld [vmem:[#allocation3] sm:$0xfe] }
 0x2ba   : > { %v545_v11 = vld [vmem:[#allocation3 + $0x8] sm:$0xfe]  ;;  %v548_v13 = vld [vmem:[#allocation3] sm:$0xfc]  ;;  %v559_v18 = vrot.slane %v544_v12, 1 }
 0x2bb   : > { %v549_v14 = vld [vmem:[#allocation3 + $0x8] sm:$0xfc]  ;;  %v562_v16 = vrot.slane %v545_v11, 1  ;;  %v588_v19 = vrot.slane %v548_v13, 2  ;;  %v540_v52 = vld [vmem:[#allocation3] sm:$0xff] }
 0x2bc   : > { %v542_v17 = vld [vmem:[#allocation3 + $0x10] sm:$0xff]  ;;  %v591_v20 = vrot.slane %v549_v14, 2  ;;  %v541_v49 = vld [vmem:[#allocation3 + $0x8] sm:$0xff]  ;;  %v1283_v13 = vld [vmem:[#allocation9 + $0xd0] sm:$0xff]  }
 0x2bd   : > { %v543_v15 = vld [vmem:[#allocation3 + $0x18] sm:$0xff]  ;;  %v560_v24 = vrot.slane %v542_v17, 1  ;;  %v589_v31 = vrot.slane %v542_v17, 2  ;;  %v617_v56 = vpack.c.bf16 %v542_v17, %v540_v52 }
 0x2be   : > { %v563_v22 = vrot.slane %v543_v15, 1  ;;  %v546_v23 = vld [vmem:[#allocation3 + $0x20] sm:$0x1]  ;;  %v592_v32 = vrot.slane %v543_v15, 2 }
 0x2bf   : > { %v547_v21 = vld [vmem:[#allocation3 + $0x28] sm:$0x1]  ;;  %v565_v26 = vrot.slane %v546_v23, 1  ;;  %v550_v27 = vld [vmem:[#allocation3 + $0x20] sm:$0x3]  ;;  %v561_v30 = vsel %vm558_vm5, %v559_v18, %v560_v24  ;;  %v590_v41 = vsel %vm587_vm6, %v588_v19, %v589_v31 }
 0x2c0   : > { %v567_v25 = vrot.slane %v547_v21, 1  ;;  %v551_v28 = vld [vmem:[#allocation3 + $0x28] sm:$0x3]  ;;  %v564_v29 = vsel %vm558_vm5, %v562_v16, %v563_v22  ;;  %v594_v35 = vrot.slane %v550_v27, 2  ;;  %v593_v42 = vsel %vm587_vm6, %v591_v20, %v592_v32 }
 0x2c1   : > { %v566_v34 = vsel %vm558_vm5, %v560_v24, %v565_v26  ;;  %v596_v36 = vrot.slane %v551_v28, 2  ;;  %v1233_v44 = vpack.i.bf16 %v593_v42, %v590_v41 }
 0x2c2   : > { %v568_v33 = vsel %vm558_vm5, %v563_v22, %v567_v25  ;;  %v1223_v38 = vpack.i.bf16 %v566_v34, %v561_v30  ;;  %v595_v39 = vsel %vm587_vm6, %v589_v31, %v594_v35  ;;  %v1069_v25 = vld [vmem:[%s1809_s4] ss:$0 sm:$0xff] }
 0x2c3   : > { %v1228_v37 = vpack.i.bf16 %v568_v33, %v564_v29  ;;  %v597_v40 = vsel %vm587_vm6, %v592_v32, %v596_v36 }
 0x2c4   : > { %1224 = vrot.lane.b32.xlu0 %v1223_v38, %s1450_s26  ;;  %v1238_v43 = vpack.i.bf16 %v597_v40, %v595_v39 }
 0x2c5   : > { %1229 = vrot.lane.b32.xlu1 %v1228_v37, %s1450_s26  ;;  %s935_s26 = scalar_lea.sflag [#allocation6], %s1667_s14 }
 0x2c8   : > { %1234 = vrot.lane.b32.xlu0 %v1233_v44, %s1453_s12 }
 0x2c9   : > { %1239 = vrot.lane.b32.xlu1 %v1238_v43, %s1453_s12 }
 0x336   : > { %v1225_v46 = vpop.permute.xlu0 %1224 }
 0x337   : > { %v1230_v45 = vpop.permute.xlu1 %1229  ;;  %v1227_v47 = vunpack.i.h.bf16 %v1225_v46  ;;  %v1226_v48 = vunpack.i.l.bf16 %v1225_v46 }
 0x338   : > { %v1232_v11 = vunpack.i.h.bf16 %v1230_v45  ;;  %v1231_v12 = vunpack.i.l.bf16 %v1230_v45 }
 0x339   : > { %v613_v50 = vsel %vm345_vm7, %v541_v49, %v1226_v48  ;;  %v614_v51 = vsel %vm345_vm7, %v543_v15, %v1227_v47 }
 0x33a   : > { %v1235_v54 = vpop.permute.xlu0 %1234  ;;  %v618_v55 = vpack.c.bf16 %v614_v51, %v613_v50  ;;  %v578_v14 = vsel %vm345_vm7, %v1227_v47, %v1232_v11  ;;  %v577_v15 = vsel %vm345_vm7, %v1226_v48, %v1231_v12 }
 0x33b   : > { %v1240_v53 = vpop.permute.xlu1 %1239  ;;  %v1237_v60 = vunpack.i.h.bf16 %v1235_v54  ;;  %v1236_v61 = vunpack.i.l.bf16 %v1235_v54 }
 0x33c   : > { %v1242_v58 = vunpack.i.h.bf16 %v1240_v53  ;;  %v1241_v59 = vunpack.i.l.bf16 %v1240_v53  ;;  %880 = vmatprep.mubr.bf16.mxu1 %v618_v55 }
 0x33d   : > { %v607_v63 = vsel %vm606_vm8, %v1236_v61, %v1237_v60  ;;  %881 = vmatmul.mubr.bf16.vlgmr.msra.gmra.mrb[0].mxu1 %v617_v56  ;;  %v615_v17 = vsel %vm606_vm8, %v577_v15, %v1236_v61 }
 0x33e   : > { %v608_v62 = vsel %vm606_vm8, %v1241_v59, %v1242_v58  ;;  %890 = vmatpush1.bf16.msra.mxu1 %v1273_v57  ;;  %v616_v16 = vsel %vm606_vm8, %v578_v14, %v1241_v59 }
 0x33f   : > { %v620_v0 = vpack.c.bf16 %v608_v62, %v607_v63  ;;  %891 = vmatprep.subr.bf16.mxu1 %v1449_v6  ;;  %v619_v18 = vpack.c.bf16 %v616_v16, %v615_v17 }
 0x341   : > { %1097 = vmatprep.mubr.msk.bf16.mxu1 %vm844_vm9, %v620_v0 }
 0x342   : > { %892 = vmatpush1.bf16.msra.mxu1 %v1274_v1 }
 0x343   : > { %893 = vmatprep.subr.bf16.mxu1 %v1449_v6 }
 0x346   : > { %894 = vmatpush1.bf16.msra.mxu1 %v1275_v2 }
 0x347   : > { %895 = vmatprep.subr.bf16.mxu1 %v1449_v6 }
 0x34a   : > { %896 = vmatpush1.bf16.msra.mxu1 %v1276_v3 }
 0x34b   : > { %897 = vmatprep.subr.bf16.mxu1 %v1449_v6 }
 0x34e   : > { %898 = vmatpush1.bf16.msra.mxu1 %v1277_v4 }
 0x34f   : > { %899 = vmatprep.subr.bf16.mxu1 %v1449_v6 }
 0x352   : > { %900 = vmatpush1.bf16.msra.mxu1 %v1278_v5 }
 0x353   : > { %901 = vmatprep.subr.bf16.mxu1 %v1449_v6 }
 0x356   : > { %902 = vmatpush1.bf16.msra.mxu1 %v1279_v7 }
 0x357   : > { %903 = vmatprep.subr.bf16.mxu1 %v1449_v6 }
 0x35a   : > { %904 = vmatpush1.bf16.msra.mxu1 %v1280_v8 }
 0x35b   : > { %905 = vmatprep.subr.bf16.mxu1 %v1449_v6 }
 0x35e   : > { %906 = vmatpush1.bf16.msra.mxu1 %v1281_v9 }
 0x35f   : > { %907 = vmatprep.subr.bf16.mxu1 %v1449_v6 }
 0x362   : > { %908 = vmatpush1.bf16.msra.mxu1 %v1282_v10 }
 0x363   : > { %909 = vmatprep.subr.bf16.mxu1 %v1449_v6 }
 0x366   : > { %910 = vmatpush1.bf16.msra.mxu1 %v1283_v13 }
 0x369   : > { %922 = vmatmul.mubr.bf16.vlgmr.msra.gmra.mrb[4].mxu1 %v619_v18 }
 0x410   : > { %v1125_v19 = vpop.f32.mrb[0].mxu1 }
 0x411   : > { %v1126_v20 = vpop.f32.mrb[1].mxu1 }
 0x412   : > { %v1127_v21 = vadd.f32 %v1126_v20, %v1125_v19  ;;  %v1128_v22 = vpop.f32.mrb[2].mxu1 }
 0x413   : > { %v1129_v23 = vpop.f32.mrb[3].mxu1 }
 0x414   : > { %v1130_v24 = vadd.f32 %v1129_v23, %v1128_v22  ;;  %v883_v6 = vadd.f32 %v1127_v21, %v1069_v25 }
 0x416   : > { %v886_v29 = vadd.f32 %v1130_v24, %v1069_v25 }
 0x43c   : > { %v923_v26 = vpop.f32.mrb[4].mxu1 }
 0x43d   : > { %v924_v27 = vadd.f32 %v923_v26, %v883_v6  ;;  %v925_v28 = vpop.f32.mrb[5].mxu1 }
 0x43e   : > { %v926_v30 = vpop.f32.mrb[6].mxu1 }
 0x43f   : > { %v930_v31 = vmax.f32 %v924_v27, 0.0  ;;  %v927_v32 = vadd.f32 %v926_v30, %v886_v29  ;;  %v928_v33 = vpop.f32.mrb[7].mxu1 }
 0x441   : > { %932 = vst [vmem:[%s271_s17] sm:$0xff] %v930_v31  ;;  %v931_v34 = vmax.f32 %v927_v32, 0.0 }
 0x443   : > { %933 = vst [vmem:[%s271_s17 + $0x8] sm:$0xff] %v931_v34 }
 0x444   : > { %1383 = shalt.err (!%p1380_p1)
}
 0x445   : > { %s1384_s12 = scalar_lea.hbm %s1760_s24, 256  ;;  %s1388_s11 = scalar_lea.hbm %s1810_s5, 512 }
 0x446   : > { %p1385_p13 = scmp.ne.s32.totalorder %s1760_s24, %s1384_s12  ;;  %p1389_p4 = scmp.lt.u32.totalorder %s1760_s24, %s1810_s5 }
 0x447   : > { %p1390_p5 = scmp.lt.u32.totalorder %s1388_s11, %s1384_s12  ;;  %p1392_p8 = scmp.lt.u32.totalorder %s1384_s12, %s1760_s24 }
 0x448   : > { %p1386_p6 = pnand %p1385_p13, %p1824_p0 }
 0x449   : > { %p1391_p11 = por %p1390_p5, %p1389_p4 }
 0x44a   : > { %p1387_p10 = pneg %p1386_p6 }
 0x44b   : > { %p1393_p2 = por %p1392_p8, %p1391_p11 }
 0x44d   : > { %p1394_p3 = pnand %p1393_p2, %p1387_p10 }
 0x44f   : > { %1397 = shalt.err (!%p1394_p3)
}
 0x450   : > { %s1455_s8 = smov 128  }
 0x451   : > { %1141 = dma.vmem_to_hbm [thread:$0]  (%p1824_p0), %s1755_s7, 256, %s1760_s24, %s935_s26, %s1455_s8, %s1455_s8, %s1452_s28  }
 0x452 PF: > { %s963_s9 = sand.u32 1, %s1428_s18   ;;  %p1825_p7 = scmp.ne.s32.totalorder %s1815_s25, 0 }
 0x453   : > { %p1826_p9 = scmp.ge.s32.totalorder %s1440_s21, 2  ;;  %s964_s15 = scalar_lea.sflag [#allocation6], %s963_s9 }
 0x455   : > { %p1155_p12 = pnand %p1826_p9, %p1825_p7 }
 0x457   : > { %1423 = dma.done.wait (!%p1155_p12), %s964_s15, 256  }
 0x458   : > { %1425 = vsyncadd (!%p1155_p12), %s964_s15, 4294967040  ;;  %p19_p1 = scmp.ge.s32.totalorder %s1602_s29, 4   ;;  %s1827_s18 = smov %s1432_s19 }
 0x459   : > { %s1828_s19 = smov %s1436_s20  ;;  %s1829_s20 = smov %s1618_s27 }
 0x45a   : > { %s1830_s21 = smov %s1602_s29  ;;  %21 = sbr.rel (!%p19_p1) target bundleno = 6 (0x6), region = 94 }
 0x461   :  { %969 = vsyncpa [#allocation5], 1 }
 0x462   :  { %971 = vsyncpa [#allocation5 + $0x1], 1 }
 0x463   :  { %972 = vsyncpa [#allocation8], 1 }
 0x464   :  { %973 = vsyncpa [#allocation6], 1 }
 0x465   :  { %975 = vsyncpa [#allocation6 + $0x1], 1 }

</bundles_post_ra>
